<compile_context>
chip_gen: v7x
topology: tpu7x:2x2x1
jax: 0.10.0
libtpu: 0.0.40
codegen_flags: <defaults>
</compile_context>

<pallas_src>
import jax
import jax.numpy as jnp
from jax.experimental import pallas as pl
from jax.experimental.pallas import tpu as pltpu


NEG_SLOPE = 0.01  # torch.nn.LeakyReLU default


def _leaky_relu(x):
    return jnp.where(x > 0, x, NEG_SLOPE * x)


def mlp_kernel(x_ref,
               w0_ref, b0_ref,
               w1_ref, b1_ref,
               w2_ref, b2_ref,
               w3_ref, b3_ref,
               o_ref):
    # Fused 4-layer MLP on one row tile: 4 MXU matmuls (bf16 operands,
    # f32 accumulation) + f32 VPU bias-add / LeakyReLU.  All of this sits in
    # the slack under the output DMA; no MXU-occupancy tuning is warranted.
    cdt = w0_ref.dtype                      # compute (MXU operand) dtype
    b0 = b0_ref[...]                        # biases loaded once (f32)
    b1 = b1_ref[...]
    b2 = b2_ref[...]
    b3 = b3_ref[...]

    x = x_ref[...].astype(cdt)              # f32 -> bf16 cast done in-kernel
    h = jnp.dot(x, w0_ref[...], preferred_element_type=jnp.float32) + b0
    h = _leaky_relu(h)
    h = jnp.dot(h.astype(cdt), w1_ref[...], preferred_element_type=jnp.float32) + b1
    h = _leaky_relu(h)
    h = jnp.dot(h.astype(cdt), w2_ref[...], preferred_element_type=jnp.float32) + b2
    h = _leaky_relu(h)
    h = jnp.dot(h.astype(cdt), w3_ref[...], preferred_element_type=jnp.float32) + b3
    o_ref[...] = h.astype(o_ref.dtype)


def pose_embedder_forward(target_poses, params, num_channels, spatial_size,
                          *, compute_dtype=jnp.bfloat16, row_tile=4096,
                          output_dtype=jnp.float32):
    """target_poses: (b, t, K) float32. Returns (b, t, C, S, S) output_dtype."""
    b, t = target_poses.shape[:2]
    x = target_poses.reshape(b * t, -1)          # (N, K), stays f32
    N, K = x.shape
    (w0, b0), (w1, b1), (w2, b2), (w3, b3) = params
    H = w0.shape[1]
    Dout = w3.shape[1]
    assert Dout == num_channels * spatial_size ** 2

    # --- row tile selection (no materialized padding; Pallas masks the ragged
    # last block).  Aim for >= 2 grid steps so v7x's second TC gets work, and
    # cap at row_tile to bound VMEM.  tm stays 8-aligned (sublane). ---
    half = -(-N // 2)                            # cdiv(N, 2)
    half8 = ((half + 7) // 8) * 8
    tm = max(8, min(row_tile, half8))
    grid = (pl.cdiv(N, tm),)

    # --- weights pre-cast once to bf16 (MXU operands); biases stay f32. ---
    w0c = w0.astype(compute_dtype)
    w1c = w1.astype(compute_dtype)
    w2c = w2.astype(compute_dtype)
    w3c = w3.astype(compute_dtype)

    row_in = pl.BlockSpec((tm, K), lambda i: (i, 0))       # streamed input tile
    row_out = pl.BlockSpec((tm, Dout), lambda i: (i, 0))   # streamed output tile

    def resident(shape):
        # Weights / biases: constant block index -> held in VMEM across steps.
        return pl.BlockSpec(shape, lambda i: (0, 0))

    out = pl.pallas_call(
        mlp_kernel,
        out_shape=jax.ShapeDtypeStruct((N, Dout), output_dtype),
        grid=grid,
        in_specs=[
            row_in,
            resident((K, H)), resident((1, H)),
            resident((H, H)), resident((1, H)),
            resident((H, H)), resident((1, H)),
            resident((H, Dout)), resident((1, Dout)),
        ],
        out_specs=row_out,
        compiler_params=pltpu.CompilerParams(
            dimension_semantics=("parallel",)),   # shard row tiles across TCs (v7x)
    )(x, w0c, b0, w1c, b1, w2c, b2, w3c, b3)

    # pose_embeds.view(-1, C, S, S) then .view(b, t, C, S, S) — pure view.
    return out.reshape(b, t, num_channels, spatial_size, spatial_size)


def init_params(key, in_channels, hidden, out_dim):
    """Deterministic init. Weights stored as (in, out) = PyTorch weight.T."""
    dims = [(in_channels, hidden), (hidden, hidden), (hidden, hidden), (hidden, out_dim)]
    params = []
    for din, dout in dims:
        kw, kb, key = jax.random.split(key, 3)
        bound = 1.0 / jnp.sqrt(din)
        w = jax.random.uniform(kw, (din, dout), jnp.float32, -bound, bound)
        bb = jax.random.uniform(kb, (1, dout), jnp.float32, -bound, bound)
        params.append((w, bb))
    return params


def reference_forward(target_poses, params, num_channels, spatial_size,
                      compute_dtype=jnp.float32):
    """Pure-JAX reference. With compute_dtype=bf16 it mirrors the kernel's
    precision scheme (bf16 operands, f32 accumulation, f32 bias/activation)."""
    b, t = target_poses.shape[:2]
    h = target_poses.reshape(b * t, -1)
    for i, (w, bi) in enumerate(params):
        h = jnp.dot(h.astype(compute_dtype), w.astype(compute_dtype),
                    preferred_element_type=jnp.float32) + bi
        if i < len(params) - 1:
            h = jnp.where(h > 0, h, NEG_SLOPE * h)
    return h.reshape(b, t, num_channels, spatial_size, spatial_size)


if __name__ == "__main__":
    # Small, shape-consistent config:
    #   pse_in_channels=16, pse_num_channels=32, pse_num_blocks=4,
    #   inf_max_channels=4, inf_input_tensor_size=8  ->  out_dim = 4*8*8 = 256
    in_channels = 16
    hidden = 32
    num_channels = 4
    spatial_size = 8
    out_dim = num_channels * spatial_size ** 2

    key = jax.random.PRNGKey(0)
    k_pose, k_params, k_pose2 = jax.random.split(key, 3)
    params = init_params(k_params, in_channels, hidden, out_dim)

    # Case 1: tiny batch (b=2, t=2 -> N=4, single partial block).
    b, t = 2, 2
    target_poses = jax.random.normal(k_pose, (b, t, in_channels), jnp.float32)
    target_pose_embeds = pose_embedder_forward(
        target_poses, params, num_channels, spatial_size)
    target_pose_embeds = jax.block_until_ready(target_pose_embeds)
    assert target_pose_embeds.shape == (b, t, num_channels, spatial_size, spatial_size)

    ref_bf16 = reference_forward(target_poses, params, num_channels, spatial_size,
                                 compute_dtype=jnp.bfloat16)
    assert jnp.allclose(target_pose_embeds, ref_bf16, atol=1e-3, rtol=1e-3)
    ref_f32 = reference_forward(target_poses, params, num_channels, spatial_size,
                                compute_dtype=jnp.float32)
    assert jnp.allclose(target_pose_embeds, ref_f32, atol=5e-2, rtol=5e-2)

    # Case 2: ragged N with a multi-step grid (b=4, t=5 -> N=20, tm=16,
    # grid=(2,), partial last block) — exercises the no-pad path and the
    # >=2-step clamp (v7x megacore sharding).
    b2, t2 = 4, 5
    target_poses2 = jax.random.normal(k_pose2, (b2, t2, in_channels), jnp.float32)
    embeds2 = pose_embedder_forward(
        target_poses2, params, num_channels, spatial_size)
    embeds2 = jax.block_until_ready(embeds2)
    assert embeds2.shape == (b2, t2, num_channels, spatial_size, spatial_size)
    ref2_bf16 = reference_forward(target_poses2, params, num_channels, spatial_size,
                                  compute_dtype=jnp.bfloat16)
    assert jnp.allclose(embeds2, ref2_bf16, atol=1e-3, rtol=1e-3)
    ref2_f32 = reference_forward(target_poses2, params, num_channels, spatial_size,
                                 compute_dtype=jnp.float32)
    assert jnp.allclose(embeds2, ref2_f32, atol=5e-2, rtol=5e-2)

    # TODO(synk): harmonic encoding branch (pse_use_harmonic_enc) is force-disabled
    # in the original module, so it is intentionally not implemented.
    # TODO(synk): pse_emb_source_pose branch would just reuse this same kernel on
    # source_poses; omitted since the default arg is False.
    print("KERNEL_OK")
</pallas_src>

<mosaic_0001>
module attributes {stable_mosaic.version = 11 : i64} {
  func.func @mlp_kernel(%arg0: i32, %arg1: memref<8x16xf32, #tpu.memory_space<vmem>>, %arg2: memref<16x32xbf16, #tpu.memory_space<vmem>>, %arg3: memref<1x32xf32, #tpu.memory_space<vmem>>, %arg4: memref<32x32xbf16, #tpu.memory_space<vmem>>, %arg5: memref<1x32xf32, #tpu.memory_space<vmem>>, %arg6: memref<32x32xbf16, #tpu.memory_space<vmem>>, %arg7: memref<1x32xf32, #tpu.memory_space<vmem>>, %arg8: memref<32x256xbf16, #tpu.memory_space<vmem>>, %arg9: memref<1x256xf32, #tpu.memory_space<vmem>>, %arg10: memref<8x256xf32, #tpu.memory_space<vmem>>) attributes {dimension_semantics = [#tpu.dimension_semantics<parallel>], iteration_bounds = array<i64: 1>, scalar_prefetch = 0 : i64, scratch_operands = 0 : i64, tpu.core_type = #tpu.core_type<tc>, window_params = [{transform_indices = @transform_0, window_bounds = array<i64: 8, 16>}, {pipeline_mode = #tpu.pipeline_mode<synchronous>, transform_indices = @transform_1, window_bounds = array<i64: 16, 32>}, {pipeline_mode = #tpu.pipeline_mode<synchronous>, transform_indices = @transform_2, window_bounds = array<i64: 1, 32>}, {pipeline_mode = #tpu.pipeline_mode<synchronous>, transform_indices = @transform_3, window_bounds = array<i64: 32, 32>}, {pipeline_mode = #tpu.pipeline_mode<synchronous>, transform_indices = @transform_4, window_bounds = array<i64: 1, 32>}, {pipeline_mode = #tpu.pipeline_mode<synchronous>, transform_indices = @transform_5, window_bounds = array<i64: 32, 32>}, {pipeline_mode = #tpu.pipeline_mode<synchronous>, transform_indices = @transform_6, window_bounds = array<i64: 1, 32>}, {pipeline_mode = #tpu.pipeline_mode<synchronous>, transform_indices = @transform_7, window_bounds = array<i64: 32, 256>}, {pipeline_mode = #tpu.pipeline_mode<synchronous>, transform_indices = @transform_8, window_bounds = array<i64: 1, 256>}, {transform_indices = @transform_9, window_bounds = array<i64: 8, 256>}]} {
    %c0 = arith.constant 0 : index
    %c0_0 = arith.constant 0 : index
    %0 = vector.load %arg3[%c0, %c0_0] : memref<1x32xf32, #tpu.memory_space<vmem>>, vector<1x32xf32>
    %c0_1 = arith.constant 0 : index
    %c0_2 = arith.constant 0 : index
    %1 = vector.load %arg5[%c0_1, %c0_2] : memref<1x32xf32, #tpu.memory_space<vmem>>, vector<1x32xf32>
    %c0_3 = arith.constant 0 : index
    %c0_4 = arith.constant 0 : index
    %2 = vector.load %arg7[%c0_3, %c0_4] : memref<1x32xf32, #tpu.memory_space<vmem>>, vector<1x32xf32>
    %c0_5 = arith.constant 0 : index
    %c0_6 = arith.constant 0 : index
    %3 = vector.load %arg9[%c0_5, %c0_6] : memref<1x256xf32, #tpu.memory_space<vmem>>, vector<1x256xf32>
    %c0_7 = arith.constant 0 : index
    %c0_8 = arith.constant 0 : index
    %4 = vector.load %arg1[%c0_7, %c0_8] : memref<8x16xf32, #tpu.memory_space<vmem>>, vector<8x16xf32>
    %5 = arith.truncf %4 : vector<8x16xf32> to vector<8x16xbf16>
    %c0_9 = arith.constant 0 : index
    %c0_10 = arith.constant 0 : index
    %6 = vector.load %arg2[%c0_9, %c0_10] : memref<16x32xbf16, #tpu.memory_space<vmem>>, vector<16x32xbf16>
    %cst = arith.constant dense<0.000000e+00> : vector<8x32xf32>
    %7 = tpu.matmul %5, %6, %cst {dimension_numbers = #tpu.dot_dimension_numbers<[1], [0], [0], [1], [0, 0, 1, 1], [], []>} : vector<8x16xbf16>, vector<16x32xbf16>, vector<8x32xf32> -> vector<8x32xf32>
    %8 = vector.broadcast %0 : vector<1x32xf32> to vector<8x32xf32>
    %9 = arith.addf %7, %8 : vector<8x32xf32>
    %cst_11 = arith.constant 0.000000e+00 : f32
    %10 = vector.broadcast %cst_11 : f32 to vector<8x32xf32>
    %11 = arith.cmpf ogt, %9, %10 : vector<8x32xf32>
    %cst_12 = arith.constant 0.00999999977 : f32
    %12 = vector.broadcast %cst_12 : f32 to vector<8x32xf32>
    %13 = arith.mulf %12, %9 : vector<8x32xf32>
    %14 = arith.select %11, %9, %13 : vector<8x32xi1>, vector<8x32xf32>
    %15 = arith.truncf %14 : vector<8x32xf32> to vector<8x32xbf16>
    %c0_13 = arith.constant 0 : index
    %c0_14 = arith.constant 0 : index
    %16 = vector.load %arg4[%c0_13, %c0_14] : memref<32x32xbf16, #tpu.memory_space<vmem>>, vector<32x32xbf16>
    %cst_15 = arith.constant dense<0.000000e+00> : vector<8x32xf32>
    %17 = tpu.matmul %15, %16, %cst_15 {dimension_numbers = #tpu.dot_dimension_numbers<[1], [0], [0], [1], [0, 0, 1, 1], [], []>} : vector<8x32xbf16>, vector<32x32xbf16>, vector<8x32xf32> -> vector<8x32xf32>
    %18 = vector.broadcast %1 : vector<1x32xf32> to vector<8x32xf32>
    %19 = arith.addf %17, %18 : vector<8x32xf32>
    %cst_16 = arith.constant 0.000000e+00 : f32
    %20 = vector.broadcast %cst_16 : f32 to vector<8x32xf32>
    %21 = arith.cmpf ogt, %19, %20 : vector<8x32xf32>
    %cst_17 = arith.constant 0.00999999977 : f32
    %22 = vector.broadcast %cst_17 : f32 to vector<8x32xf32>
    %23 = arith.mulf %22, %19 : vector<8x32xf32>
    %24 = arith.select %21, %19, %23 : vector<8x32xi1>, vector<8x32xf32>
    %25 = arith.truncf %24 : vector<8x32xf32> to vector<8x32xbf16>
    %c0_18 = arith.constant 0 : index
    %c0_19 = arith.constant 0 : index
    %26 = vector.load %arg6[%c0_18, %c0_19] : memref<32x32xbf16, #tpu.memory_space<vmem>>, vector<32x32xbf16>
    %cst_20 = arith.constant dense<0.000000e+00> : vector<8x32xf32>
    %27 = tpu.matmul %25, %26, %cst_20 {dimension_numbers = #tpu.dot_dimension_numbers<[1], [0], [0], [1], [0, 0, 1, 1], [], []>} : vector<8x32xbf16>, vector<32x32xbf16>, vector<8x32xf32> -> vector<8x32xf32>
    %28 = vector.broadcast %2 : vector<1x32xf32> to vector<8x32xf32>
    %29 = arith.addf %27, %28 : vector<8x32xf32>
    %cst_21 = arith.constant 0.000000e+00 : f32
    %30 = vector.broadcast %cst_21 : f32 to vector<8x32xf32>
    %31 = arith.cmpf ogt, %29, %30 : vector<8x32xf32>
    %cst_22 = arith.constant 0.00999999977 : f32
    %32 = vector.broadcast %cst_22 : f32 to vector<8x32xf32>
    %33 = arith.mulf %32, %29 : vector<8x32xf32>
    %34 = arith.select %31, %29, %33 : vector<8x32xi1>, vector<8x32xf32>
    %35 = arith.truncf %34 : vector<8x32xf32> to vector<8x32xbf16>
    %c0_23 = arith.constant 0 : index
    %c0_24 = arith.constant 0 : index
    %36 = vector.load %arg8[%c0_23, %c0_24] : memref<32x256xbf16, #tpu.memory_space<vmem>>, vector<32x256xbf16>
    %cst_25 = arith.constant dense<0.000000e+00> : vector<8x256xf32>
    %37 = tpu.matmul %35, %36, %cst_25 {dimension_numbers = #tpu.dot_dimension_numbers<[1], [0], [0], [1], [0, 0, 1, 1], [], []>} : vector<8x32xbf16>, vector<32x256xbf16>, vector<8x256xf32> -> vector<8x256xf32>
    %38 = vector.broadcast %3 : vector<1x256xf32> to vector<8x256xf32>
    %39 = arith.addf %37, %38 : vector<8x256xf32>
    %c0_26 = arith.constant 0 : index
    %c0_27 = arith.constant 0 : index
    %40 = vector.load %arg10[%c0_26, %c0_27] : memref<8x256xf32, #tpu.memory_space<vmem>>, vector<8x256xf32>
    tpu.vector_store %arg10[%c0_26, %c0_27], %39 {strides = array<i32>} : memref<8x256xf32, #tpu.memory_space<vmem>>, vector<8x256xf32>,
    return
  }
  func.func @transform_0(%arg0: i32) -> (i32, i32) {
    %c0_i32 = arith.constant 0 : i32
    %c0_i32_0 = arith.constant 0 : i32
    return %arg0, %c0_i32 : i32, i32
  }
  func.func @transform_1(%arg0: i32) -> (i32, i32) {
    %c0_i32 = arith.constant 0 : i32
    %c0_i32_0 = arith.constant 0 : i32
    %c0_i32_1 = arith.constant 0 : i32
    return %c0_i32, %c0_i32_0 : i32, i32
  }
  func.func @transform_2(%arg0: i32) -> (i32, i32) {
    %c0_i32 = arith.constant 0 : i32
    %c0_i32_0 = arith.constant 0 : i32
    %c0_i32_1 = arith.constant 0 : i32
    return %c0_i32, %c0_i32_0 : i32, i32
  }
  func.func @transform_3(%arg0: i32) -> (i32, i32) {
    %c0_i32 = arith.constant 0 : i32
    %c0_i32_0 = arith.constant 0 : i32
    %c0_i32_1 = arith.constant 0 : i32
    return %c0_i32, %c0_i32_0 : i32, i32
  }
  func.func @transform_4(%arg0: i32) -> (i32, i32) {
    %c0_i32 = arith.constant 0 : i32
    %c0_i32_0 = arith.constant 0 : i32
    %c0_i32_1 = arith.constant 0 : i32
    return %c0_i32, %c0_i32_0 : i32, i32
  }
  func.func @transform_5(%arg0: i32) -> (i32, i32) {
    %c0_i32 = arith.constant 0 : i32
    %c0_i32_0 = arith.constant 0 : i32
    %c0_i32_1 = arith.constant 0 : i32
    return %c0_i32, %c0_i32_0 : i32, i32
  }
  func.func @transform_6(%arg0: i32) -> (i32, i32) {
    %c0_i32 = arith.constant 0 : i32
    %c0_i32_0 = arith.constant 0 : i32
    %c0_i32_1 = arith.constant 0 : i32
    return %c0_i32, %c0_i32_0 : i32, i32
  }
  func.func @transform_7(%arg0: i32) -> (i32, i32) {
    %c0_i32 = arith.constant 0 : i32
    %c0_i32_0 = arith.constant 0 : i32
    %c0_i32_1 = arith.constant 0 : i32
    return %c0_i32, %c0_i32_0 : i32, i32
  }
  func.func @transform_8(%arg0: i32) -> (i32, i32) {
    %c0_i32 = arith.constant 0 : i32
    %c0_i32_0 = arith.constant 0 : i32
    %c0_i32_1 = arith.constant 0 : i32
    return %c0_i32, %c0_i32_0 : i32, i32
  }
  func.func @transform_9(%arg0: i32) -> (i32, i32) {
    %c0_i32 = arith.constant 0 : i32
    %c0_i32_0 = arith.constant 0 : i32
    return %arg0, %c0_i32 : i32, i32
  }
}

</mosaic_0001>

<bundles_post_ra>
// kernel: tpu_custom_call.1
= control target key start
LH: loop header
LB: loop body
LE: loop exit
PB: predicated region body
PF: predicated region fallthrough
CT: control target
= control target key end

     0   :  { %14 = vsyncpa [#allocation3], 0  ;;  %s853_s0 = inlined_call_operand.hbm [shape: f32[4,16], index: 0, kind: input, shape index: {}]   ;;  %s854_s1 = inlined_call_operand.hbm [shape: bf16[16,32], index: 1, kind: input, shape index: {}]   ;;  %s855_s2 = inlined_call_operand.hbm [shape: f32[1,32], index: 2, kind: input, shape index: {}]   ;;  %s856_s3 = inlined_call_operand.hbm [shape: bf16[32,32], index: 3, kind: input, shape index: {}]   ;;  %s857_s4 = inlined_call_operand.hbm [shape: f32[1,32], index: 4, kind: input, shape index: {}]   ;;  %s858_s5 = inlined_call_operand.vmem [shape: bf16[32,32], index: 5, kind: input, shape index: {}]   ;;  %s859_s6 = inlined_call_operand.vmem [shape: f32[1,32], index: 6, kind: input, shape index: {}]   ;;  %s860_s7 = inlined_call_operand.hbm [shape: bf16[32,256], index: 7, kind: input, shape index: {}]   ;;  %s861_s8 = inlined_call_operand.vmem [shape: f32[1,256], index: 8, kind: input, shape index: {}]   ;;  %s862_s9 = inlined_call_operand.hbm [shape: f32[4,256], index: 9, kind: output, shape index: {}]  }
   0x1   :  { %15 = vsyncpa [#allocation6], 0 }
   0x2   :  { %16 = vsyncpa [#allocation9], 0 }
   0x3   :  { %17 = vsyncpa [#allocation12], 0 }
   0x4   :  { %18 = vsyncpa [#allocation4], 0 }
   0x5   :  { %23 = vsyncadd [#allocation3], 64  ;;  %s661_s30 = smov [#allocation5]   ;;  %s662_s11 = smov [#allocation8]  }
   0x6   :  { %s36_s10 = sshll.u32 %s661_s30, 4  ;;  %s58_s12 = sshll.u32 %s662_s11, 4  ;;  %s37_s10 = int_to_ptr.vmem [resolvable:$true] %s36_s10  ;;  %s725_s12 = int_to_ptr.vmem [resolvable:$true] %s58_s12 }
   0x7   :  { %s497_s15 = scalar_lea.hbm %s854_s1, 128 }
   0x8   :  { %p498_p0 = scmp.ne.s32.totalorder %s854_s1, %s497_s15  ;;  %p501_p1 = scmp.lt.u32.totalorder %s497_s15, %s854_s1 }
   0xa   :  { %p503_p2 = pnand %p501_p1, %p498_p0 }
   0xc   :  { %506 = shalt.err (!%p503_p2)
}
   0xd   :  { %s507_s20 = scalar_lea.vmem %s37_s10, 128  ;;  %p512_p4 = scmp.lt.s32.totalorder %s37_s10, %s37_s10 }
   0xe   :  { %p508_p3 = scmp.ne.s32.totalorder %s37_s10, %s507_s20  ;;  %p513_p5 = scmp.lt.s32.totalorder %s507_s20, %s507_s20 }
  0x10   :  { %p514_p6 = por %p513_p5, %p512_p4 }
  0x12   :  { %p515_p7 = pnand %p514_p6, %p508_p3 }
  0x14   :  { %518 = shalt.err (!%p515_p7)
}
  0x15   :  { %s663_s21 = smov 64   ;;  %s664_s22 = smov 4  }
  0x16   :  { %42 = dma.hbm_to_vmem [thread:$0]  %s854_s1, 128, %s37_s10, [#allocation6], %s663_s21, %s663_s21, %s664_s22  }
  0x17   :  { %s519_s27 = scalar_lea.hbm %s856_s3, 256 }
  0x18   :  { %p520_p8 = scmp.ne.s32.totalorder %s856_s3, %s519_s27  ;;  %p523_p9 = scmp.lt.u32.totalorder %s519_s27, %s856_s3 }
  0x1a   :  { %p525_p10 = pnand %p523_p9, %p520_p8 }
  0x1c   :  { %528 = shalt.err (!%p525_p10)
}
  0x1d   :  { %s529_s13 = scalar_lea.vmem %s725_s12, 256  ;;  %p534_p12 = scmp.lt.s32.totalorder %s725_s12, %s725_s12 }
  0x1e   :  { %p530_p11 = scmp.ne.s32.totalorder %s725_s12, %s529_s13  ;;  %p535_p13 = scmp.lt.s32.totalorder %s529_s13, %s529_s13 }
  0x20   :  { %p536_p0 = por %p535_p13, %p534_p12 }
  0x22   :  { %p537_p1 = pnand %p536_p0, %p530_p11 }
  0x24   :  { %540 = shalt.err (!%p537_p1)
}
  0x25   :  { %64 = dma.hbm_to_vmem [thread:$0]  %s856_s3, 256, %s725_s12, [#allocation9], %s663_s21, %s663_s21, %s664_s22  }
  0x26   :  { %s665_s14 = smov [#allocation2]   ;;  %s666_s16 = smov [#allocation7]  }
  0x27   :  { %s24_s15 = sshll.u32 %s665_s14, 4  ;;  %s49_s17 = sshll.u32 %s666_s16, 4  ;;  %s25_s15 = int_to_ptr.vmem [resolvable:$true] %s24_s15  ;;  %s50_s17 = int_to_ptr.vmem [resolvable:$true] %s49_s17 }
  0x28   :  { %s541_s20 = scalar_lea.hbm %s853_s0, 64 }
  0x29   :  { %p542_p2 = scmp.ne.s32.totalorder %s853_s0, %s541_s20  ;;  %p545_p3 = scmp.lt.u32.totalorder %s541_s20, %s853_s0 }
  0x2b   :  { %p547_p4 = pnand %p545_p3, %p542_p2 }
  0x2d   :  { %550 = shalt.err (!%p547_p4)
}
  0x2e   :  { %s551_s3 = scalar_lea.vmem %s25_s15, 64  ;;  %s555_s12 = scalar_lea.vmem %s25_s15, 128 }
  0x2f   :  { %p552_p5 = scmp.ne.s32.totalorder %s25_s15, %s551_s3  ;;  %p556_p6 = scmp.lt.s32.totalorder %s25_s15, %s25_s15 }
  0x30   :  { %p557_p7 = scmp.lt.s32.totalorder %s555_s12, %s551_s3 }
  0x32   :  { %p558_p8 = por %p557_p7, %p556_p6 }
  0x34   :  { %p559_p9 = pnand %p558_p8, %p552_p5 }
  0x36   :  { %562 = shalt.err (!%p559_p9)
}
  0x37   :  { %30 = dma.hbm_to_vmem [thread:$0]  %s853_s0, 64, %s25_s15, [#allocation3], %s663_s21, %s663_s21, %s664_s22  }
  0x38   :  { %s563_s11 = scalar_lea.hbm %s855_s2, 16 }
  0x39   :  { %p564_p10 = scmp.ne.s32.totalorder %s855_s2, %s563_s11  ;;  %p567_p11 = scmp.lt.u32.totalorder %s563_s11, %s855_s2 }
  0x3b   :  { %p569_p12 = pnand %p567_p11, %p564_p10 }
  0x3d   :  { %572 = shalt.err (!%p569_p12)
}
  0x3e   :  { %s573_s16 = scalar_lea.vmem %s50_s17, 16  ;;  %s577_s18 = scalar_lea.vmem %s50_s17, 32 }
  0x3f   :  { %p574_p13 = scmp.ne.s32.totalorder %s50_s17, %s573_s16  ;;  %p578_p0 = scmp.lt.s32.totalorder %s50_s17, %s50_s17 }
  0x40   :  { %p579_p1 = scmp.lt.s32.totalorder %s577_s18, %s573_s16 }
  0x42   :  { %p580_p2 = por %p579_p1, %p578_p0 }
  0x44   :  { %p581_p3 = pnand %p580_p2, %p574_p13 }
  0x46   :  { %584 = shalt.err (!%p581_p3)
}
  0x47   :  { %52 = dma.hbm_to_vmem [thread:$0]  %s855_s2, 16, %s50_s17, [#allocation6]  }
  0x48   :  { %s667_s22 = smov [#allocation10]   ;;  %s668_s19 = smov [#allocation11]  }
  0x49   :  { %s71_s15 = sshll.u32 %s667_s22, 4  ;;  %s84_s20 = sshll.u32 %s668_s19, 4  ;;  %s72_s15 = int_to_ptr.vmem [resolvable:$true] %s71_s15  ;;  %s789_s20 = int_to_ptr.vmem [resolvable:$true] %s84_s20 }
  0x4a   :  { %s585_s25 = scalar_lea.hbm %s857_s4, 16 }
  0x4b   :  { %p586_p4 = scmp.ne.s32.totalorder %s857_s4, %s585_s25  ;;  %p589_p5 = scmp.lt.u32.totalorder %s585_s25, %s857_s4 }
  0x4d   :  { %p591_p6 = pnand %p589_p5, %p586_p4 }
  0x4f   :  { %594 = shalt.err (!%p591_p6)
}
  0x50   :  { %s595_s2 = scalar_lea.vmem %s72_s15, 16  ;;  %s599_s17 = scalar_lea.vmem %s72_s15, 32 }
  0x51   :  { %p596_p7 = scmp.ne.s32.totalorder %s72_s15, %s595_s2  ;;  %p600_p8 = scmp.lt.s32.totalorder %s72_s15, %s72_s15 }
  0x52   :  { %p601_p9 = scmp.lt.s32.totalorder %s599_s17, %s595_s2 }
  0x54   :  { %p602_p10 = por %p601_p9, %p600_p8 }
  0x56   :  { %p603_p11 = pnand %p602_p10, %p596_p7 }
  0x58   :  { %606 = shalt.err (!%p603_p11)
}
  0x59   :  { %74 = dma.hbm_to_vmem [thread:$0]  %s857_s4, 16, %s72_s15, [#allocation9]  }
  0x5a   :  { %s607_s13 = scalar_lea.hbm %s860_s7, 512 }
  0x5b   :  { %p608_p12 = scmp.ne.s32.totalorder %s860_s7, %s607_s13  ;;  %p611_p13 = scmp.lt.u32.totalorder %s607_s13, %s860_s7 }
  0x5d   :  { %p613_p0 = pnand %p611_p13, %p608_p12 }
  0x5f   :  { %616 = shalt.err (!%p613_p0)
}
  0x60   :  { %s617_s18 = scalar_lea.vmem %s789_s20, 512  ;;  %p622_p2 = scmp.lt.s32.totalorder %s789_s20, %s789_s20 }
  0x61   :  { %p618_p1 = scmp.ne.s32.totalorder %s789_s20, %s617_s18  ;;  %p623_p3 = scmp.lt.s32.totalorder %s617_s18, %s617_s18 }
  0x63   :  { %p624_p4 = por %p623_p3, %p622_p2 }
  0x65   :  { %p625_p5 = pnand %p624_p4, %p618_p1 }
  0x67   :  { %628 = shalt.err (!%p625_p5)
}
  0x68   :  { %s669_s4 = smov 128   ;;  %s670_s0 = smov 8  }
  0x69   :  { %90 = dma.hbm_to_vmem [thread:$0]  %s860_s7, 512, %s789_s20, [#allocation12], %s669_s4, %s669_s4, %s670_s0  }
  0x6a   :  { %651 = dma.done.wait [#allocation3], 128  }
  0x6b   :  { %652 = vsyncadd [#allocation3], 4294967168 }
  0x6c   :  { %653 = dma.done.wait [#allocation6], 144  }
  0x6d   :  { %654 = vsyncadd [#allocation6], 4294967152 }
  0x6e   :  { %655 = dma.done.wait [#allocation9], 272  }
  0x6f   :  { %656 = vsyncadd [#allocation9], 4294967024 }
  0x70   :  { %657 = dma.done.wait [#allocation12], 512  }
  0x71   :  { %658 = vsyncadd [#allocation12], 4294966784  ;;  %v671_v0 = vmov 0.0   ;;  %vm672_vm0 = vmmov 0   ;;  %v486_v1 = vld [vmem:[#allocation5] sm:$0xff]   ;;  %v116_v2 = vld [vmem:[#allocation2] sm:$0xff]  ;;  %v324_v40 = vlaneseq }
  0x72   :  { %450 = vmatprep.subr.bf16.mxu0 %v671_v0  ;;  %452 = vmatprep.mubr.msk.bf16.mxu0 %vm672_vm0, %v671_v0  ;;  %vm132_vm1 = vcmask 130048   ;;  %v117_v3 = vpack.c.bf16 %v116_v2, %v116_v2  ;;  %v487_v4 = vld [vmem:[#allocation8] sm:$0xff]   ;;  %v488_v5 = vld [vmem:[#allocation8 + $0x8] sm:$0xff]   ;;  %v426_v6 = vld [vmem:[#allocation7] ss:$0 sm:$0xff]  ;;  %vm202_vm3 = vcmask 261120  }
  0x73   :  { %456 = vmatprep.subr.bf16.mxu1 %v671_v0  ;;  %460 = vmatprep.mubr.msk.bf16.mxu1 %vm672_vm0, %v671_v0  ;;  %v489_v15 = vld [vmem:[%s858_s5] sm:$0xff]   ;;  %v490_v16 = vld [vmem:[%s858_s5 + $0x8] sm:$0xff]   ;;  %v491_v17 = vld [vmem:[#allocation11] ss:$8 sps:$4 sm:$0xff]   ;;  %v673_v30 = vmov 0   ;;  %v325_v41 = vshrl.u32 %v324_v40, 7 }
  0x74   :  { %451 = vmatpush3.bf16.msra.mxu0 %v486_v1  ;;  %457 = vmatpush3.bf16.msra.mxu1 %v487_v4  ;;  %v493_v18 = vld [vmem:[#allocation11 + $0x4] ss:$8 sps:$4 sm:$0xff]   ;;  %v429_v19 = vld [vmem:[#allocation10] ss:$0 sm:$0xff]  ;;  %v494_v29 = vld [vmem:[#allocation11 + $0x10] ss:$8 sps:$4 sm:$0xff]  }
  0x75   :  { %464 = vmatprep.subr.bf16.mxu0 %v671_v0  ;;  %458 = vmatprep.subr.bf16.mxu1 %v671_v0  ;;  %v496_v28 = vld [vmem:[#allocation11 + $0x14] ss:$8 sps:$4 sm:$0xff]   ;;  %v433_v31 = vld [vmem:[%s859_s6] ss:$0 sm:$0xff]  ;;  %v326_v42 = vsub.s32 0, %v325_v41  ;;  %v330_v44 = vsub.s32 1, %v325_v41 }
  0x76   :  { %v115_v43 = vld [vmem:[%s861_s8] sm:$0x3] }
  0x77   :  { %453 = vmatmul.mubr.msk.bf16.vlgmr.msra.gmra.mrb[0].mxu0 %vm132_vm1, %v117_v3  ;;  %v327_v45 = vrot.slane %v115_v43, %v326_v42  ;;  %v331_v46 = vrot.slane %v115_v43, %v330_v44 }
  0x78   :  { %468 = vmatprep.mubr.msk.bf16.mxu0 %vm672_vm0, %v671_v0  ;;  %459 = vmatpush3.bf16.msra.mxu1 %v488_v5 }
  0x79   :  { %465 = vmatpush3.bf16.msra.mxu0 %v489_v15  ;;  %357 = vmatprep.subr.bf16.mxu1 %v493_v18 }
  0x7a   :  { %466 = vmatprep.subr.bf16.mxu0 %v671_v0 }
  0x7d   :  { %467 = vmatpush3.bf16.msra.mxu0 %v490_v16 }
 0x14a   :  { %v170_v7 = vpop.f32.mrb[0].mxu0 }
 0x14b   :  { %v171_v8 = vadd.f32 %v426_v6, %v170_v7  ;;  %v454_v9 = vpop.f32.mrb[1].mxu0 }
 0x14c   :  { %v173_v10 = vpop.f32.mrb[2].mxu0 }
 0x14d   :  { %vm176_vm2 = vcmp.gt.f32.partialorder %v171_v8, 0.0  ;;  %v177_v11 = vmul.f32 0.01, %v171_v8  ;;  %v455_v12 = vpop.f32.mrb[3].mxu0 }
 0x14f   :  { %v178_v13 = vsel %vm176_vm2, %v171_v8, %v177_v11 }
 0x150   :  { %v179_v14 = vpack.c.bf16 %v178_v13, %v178_v13 }
 0x152   :  { %461 = vmatmul.mubr.msk.bf16.vlgmr.msra.gmra.mrb[0].mxu1 %vm202_vm3, %v179_v14 }
 0x153   :  { %358 = vmatpush1.bf16.msra.mxu1 %v491_v17  ;;  %389 = vmatprep.mubr.bf16.mxu1 %v673_v30 }
 0x154   :  { %359 = vmatprep.subr.bf16.mxu1 %v496_v28 }
 0x157   :  { %360 = vmatpush1.bf16.msra.mxu1 %v494_v29 }
 0x225   :  { %v240_v20 = vpop.f32.mrb[0].mxu1 }
 0x226   :  { %v241_v21 = vadd.f32 %v429_v19, %v240_v20  ;;  %v462_v22 = vpop.f32.mrb[1].mxu1 }
 0x227   :  { %v243_v23 = vpop.f32.mrb[2].mxu1 }
 0x228   :  { %vm246_vm4 = vcmp.gt.f32.partialorder %v241_v21, 0.0  ;;  %v247_v24 = vmul.f32 0.01, %v241_v21  ;;  %v463_v25 = vpop.f32.mrb[3].mxu1 }
 0x22a   :  { %v248_v26 = vsel %vm246_vm4, %v241_v21, %v247_v24 }
 0x22b   :  { %v249_v27 = vpack.c.bf16 %v248_v26, %v248_v26 }
 0x22d   :  { %469 = vmatmul.mubr.msk.bf16.vlgmr.msra.gmra.mrb[4].mxu0 %vm202_vm3, %v249_v27 }
 0x300   :  { %v309_v32 = vpop.f32.mrb[4].mxu0 }
 0x301   :  { %v310_v33 = vadd.f32 %v433_v31, %v309_v32  ;;  %v470_v34 = vpop.f32.mrb[5].mxu0 }
 0x302   :  { %v312_v35 = vpop.f32.mrb[6].mxu0 }
 0x303   :  { %vm315_vm5 = vcmp.gt.f32.partialorder %v310_v33, 0.0  ;;  %v316_v36 = vmul.f32 0.01, %v310_v33  ;;  %v471_v37 = vpop.f32.mrb[7].mxu0 }
 0x305   :  { %v317_v38 = vsel %vm315_vm5, %v310_v33, %v316_v36 }
 0x306   :  { %v318_v39 = vpack.c.bf16 %v317_v38, %v317_v38 }
 0x308   :  { %441 = vmatmul.mubr.msk.bf16.vlgmr.msra.gmra.mrb[4].mxu1 %vm202_vm3, %v318_v39 }
 0x3db   :  { %v391_v47 = vpop.f32.mrb[4].mxu1 }
 0x3dc   :  { %v392_v48 = vadd.f32 %v391_v47, %v327_v45  ;;  %v393_v49 = vpop.f32.mrb[5].mxu1 }
 0x3dd   :  { %v394_v50 = vadd.f32 %v393_v49, %v331_v46  ;;  %v395_v51 = vpop.f32.mrb[6].mxu1 }
 0x3de   :  { %v396_v52 = vpop.f32.mrb[7].mxu1 }
 0x3df   :  { %v400_v53 = vcombine.low %v392_v48, %v394_v50  ;;  %v401_v54 = vcombine.high %v392_v48, %v394_v50 }
 0x3e1   :  { %404 = vst [vmem:[#allocation13] sm:$0xff] %v400_v53  ;;  %405 = vst [vmem:[#allocation13 + $0x8] sm:$0xff] %v401_v54 }
 0x3e2   :  { %410 = vsyncadd [#allocation4], 128  ;;  %s674_s6 = smov [#allocation13]  }
 0x3e3   :  { %s411_s26 = sshll.u32 %s674_s6, 4  ;;  %s412_s26 = int_to_ptr.vmem [resolvable:$true] %s411_s26 }
 0x3e4   :  { %s629_s3 = scalar_lea.vmem %s412_s26, 128  ;;  %s633_s8 = scalar_lea.vmem %s412_s26, 256 }
 0x3e5   :  { %p630_p6 = scmp.ne.s32.totalorder %s412_s26, %s629_s3  ;;  %p634_p7 = scmp.lt.s32.totalorder %s412_s26, %s412_s26 }
 0x3e6   :  { %p635_p8 = scmp.lt.s32.totalorder %s633_s8, %s629_s3 }
 0x3e8   :  { %p636_p9 = por %p635_p8, %p634_p7 }
 0x3ea   :  { %p637_p10 = pnand %p636_p9, %p630_p6 }
 0x3ec   :  { %640 = shalt.err (!%p637_p10)
}
 0x3ed   :  { %s641_s2 = scalar_lea.hbm %s862_s9, 128 }
 0x3ee   :  { %p642_p11 = scmp.ne.s32.totalorder %s862_s9, %s641_s2  ;;  %p645_p12 = scmp.lt.u32.totalorder %s641_s2, %s862_s9 }
 0x3f0   :  { %p647_p13 = pnand %p645_p12, %p642_p11 }
 0x3f2   :  { %650 = shalt.err (!%p647_p13)
}
 0x3f3   :  { %417 = dma.vmem_to_hbm [thread:$0]  %s412_s26, 128, %s862_s9, [#allocation4], %s669_s4, %s669_s4, %s670_s0  }
 0x3f4   :  { %659 = dma.done.wait [#allocation4], 256  }
 0x3f5   :  { %660 = vsyncadd [#allocation4], 4294967040 }
 0x3f6   :  { %421 = vsyncpa [#allocation3], 1 }
 0x3f7   :  { %422 = vsyncpa [#allocation6], 1 }
 0x3f8   :  { %423 = vsyncpa [#allocation9], 1 }
 0x3f9   :  { %424 = vsyncpa [#allocation12], 1 }
 0x3fa   :  { %425 = vsyncpa [#allocation4], 1 }

</bundles_post_ra>
